<compile_context>
chip_gen: v7x
topology: tpu7x:2x2x1
jax: 0.10.0
libtpu: 0.0.40
codegen_flags: <defaults>
</compile_context>

<pallas_src>
import jax
import jax.numpy as jnp
from jax.experimental import pallas as pl
from jax.experimental.pallas import tpu as pltpu

_QMAX = 127.0   # 2^(8-1) - 1
_EPS = 1e-8


def _pick_tile(n, cap, align):
    """Tile size for a dim of size n: divides n, multiple of `align`, <= ~cap.
    Falls back to the full dim (always a legal block size)."""
    if n % align != 0:
        return n
    t = min(n, max(align, (cap // align) * align))
    while n % t != 0:
        t -= align
    return t


# ---------------------------------------------------------------------------
# Pass 1: tiled abs-max of the input activation (per-tile maxima).
# ---------------------------------------------------------------------------
def _absmax_kernel(x_ref, amax_ref):
    amax_ref[0, 0] = jnp.max(jnp.abs(x_ref[...]))


# ---------------------------------------------------------------------------
# Pass 2: fused fake-quant(x) + 1x1 conv (MXU) + bias + ReLU + tile max.
#   scales_ref : SMEM (2,)  [a_sf_in, 1/a_sf_in]
#   wq_ref     : (Cout, Cin)  fake-quantized folded weight
#   b_ref      : (Cout, 1)    folded bias
#   x_ref      : (1, Cin, T)  input tile (channels x pixels)
#   y_ref      : (1, Cout, T) conv output tile
#   ymax_ref   : SMEM (1, 1)  per-tile abs-max of the ReLU output
# ---------------------------------------------------------------------------
def _conv1x1_kernel(scales_ref, wq_ref, b_ref, x_ref, y_ref, ymax_ref):
    a_sf = scales_ref[0]
    inv_a = scales_ref[1]
    xq = jnp.clip(jnp.round(x_ref[0] * inv_a), -128.0, 127.0) * a_sf
    y = jnp.dot(wq_ref[...], xq, preferred_element_type=jnp.float32)
    y = jnp.maximum(y + b_ref[...], 0.0)
    y_ref[0] = y
    ymax_ref[0, 0] = jnp.max(jnp.abs(y))


# ---------------------------------------------------------------------------
# Pass 3: output QuantAct on the conv output (lane-dense, mul-by-inverse).
# ---------------------------------------------------------------------------
def _requant_kernel(scales_ref, y_ref, o_ref):
    a_sf = scales_ref[0]
    inv_a = scales_ref[1]
    o_ref[...] = jnp.clip(jnp.round(y_ref[...] * inv_a), -128.0, 127.0) * a_sf


# ---------------------------------------------------------------------------
# Wrapper: full Q_Conv1x1Branch forward.
# ---------------------------------------------------------------------------
def q_conv1x1_branch(x_nchw, weight, gamma, beta, running_mean, running_var,
                     bn_eps=1e-5, return_aux=False):
    x = x_nchw.astype(jnp.float32)
    N, Cin, H, W = x.shape
    Cout = weight.shape[0]
    HW = H * W

    # ---- parameter prep (tiny, one-time): BN fold + weight fake-quant (jnp) ----
    w = weight.reshape(Cout, Cin).astype(jnp.float32)
    inv_std = 1.0 / jnp.sqrt(running_var.astype(jnp.float32) + bn_eps)
    g = gamma.astype(jnp.float32) * inv_std
    w_fold = w * g[:, None]
    b_fold = beta.astype(jnp.float32) - running_mean.astype(jnp.float32) * g
    w_sf = jnp.maximum(jnp.max(jnp.abs(w_fold)), _EPS) / _QMAX
    w_q = jnp.clip(jnp.round(w_fold * (1.0 / w_sf)), -128.0, 127.0) * w_sf
    b_col = b_fold.reshape(Cout, 1)

    # ---- Pass 1: tiled abs-max of x -> input activation scale ----
    M = N * Cin
    x2 = x.reshape(M, HW)                       # free reshape (row-major NCHW)
    tr = _pick_tile(M, 256, 8)
    tl = _pick_tile(HW, 2048, 128)
    gr, gl = M // tr, HW // tl
    tile_amax = pl.pallas_call(
        _absmax_kernel,
        out_shape=jax.ShapeDtypeStruct((gr, gl), jnp.float32),
        grid=(gr, gl),
        in_specs=[pl.BlockSpec((tr, tl), lambda i, j: (i, j))],
        out_specs=pl.BlockSpec((1, 1), lambda i, j: (i, j),
                               memory_space=pltpu.SMEM),
        compiler_params=pltpu.CompilerParams(
            dimension_semantics=("parallel", "parallel")),
    )(x2)
    a_sf_in = jnp.maximum(jnp.max(tile_amax), _EPS) / _QMAX
    scales_in = jnp.stack([a_sf_in, 1.0 / a_sf_in]).astype(jnp.float32)

    # ---- Pass 2: fused quant + 1x1 conv + bias + ReLU (+ per-tile out max) ----
    x3 = x.reshape(N, Cin, HW)                  # free reshape
    t_hw = _pick_tile(HW, max(128, (1 << 20) // max(Cin, Cout)), 128)
    nt = HW // t_hw
    y3, y_tile_max = pl.pallas_call(
        _conv1x1_kernel,
        out_shape=(jax.ShapeDtypeStruct((N, Cout, HW), jnp.float32),
                   jax.ShapeDtypeStruct((N, nt), jnp.float32)),
        grid=(N, nt),
        in_specs=[
            pl.BlockSpec(memory_space=pltpu.SMEM),                   # scales (2,)
            pl.BlockSpec((Cout, Cin), lambda n, t: (0, 0)),          # w_q (resident)
            pl.BlockSpec((Cout, 1), lambda n, t: (0, 0)),            # bias (resident)
            pl.BlockSpec((1, Cin, t_hw), lambda n, t: (n, 0, t)),    # x tile
        ],
        out_specs=(
            pl.BlockSpec((1, Cout, t_hw), lambda n, t: (n, 0, t)),   # y tile
            pl.BlockSpec((1, 1), lambda n, t: (n, t),
                         memory_space=pltpu.SMEM),                   # tile max
        ),
        compiler_params=pltpu.CompilerParams(
            dimension_semantics=("parallel", "parallel")),
    )(scales_in, w_q, b_col, x3)

    a_sf_out = jnp.maximum(jnp.max(y_tile_max), _EPS) / _QMAX
    scales_out = jnp.stack([a_sf_out, 1.0 / a_sf_out]).astype(jnp.float32)

    # ---- Pass 3: output QuantAct over the conv output only ----
    out3 = pl.pallas_call(
        _requant_kernel,
        out_shape=jax.ShapeDtypeStruct((N, Cout, HW), jnp.float32),
        grid=(N, nt),
        in_specs=[
            pl.BlockSpec(memory_space=pltpu.SMEM),                   # scales (2,)
            pl.BlockSpec((1, Cout, t_hw), lambda n, t: (n, 0, t)),
        ],
        out_specs=pl.BlockSpec((1, Cout, t_hw), lambda n, t: (n, 0, t)),
        compiler_params=pltpu.CompilerParams(
            dimension_semantics=("parallel", "parallel")),
    )(scales_out, y3)

    out = out3.reshape(N, Cout, H, W)           # free reshape
    if return_aux:
        aux = dict(a_sf_in=a_sf_in, w_sf=w_sf,
                   y_raw=y3.reshape(N, Cout, H, W))
        return out, a_sf_out, aux
    return out, a_sf_out


# ---------------------------------------------------------------------------
# Pure-JAX reference (same quantization conventions: multiply by 1/scale).
# ---------------------------------------------------------------------------
def _reference(x, weight, gamma, beta, mean, var, eps=1e-5):
    x = x.astype(jnp.float32)
    Cout, Cin = weight.shape[0], weight.shape[1]
    w = weight.reshape(Cout, Cin).astype(jnp.float32)
    inv_std = 1.0 / jnp.sqrt(var.astype(jnp.float32) + eps)
    g = gamma.astype(jnp.float32) * inv_std
    w_fold = w * g[:, None]
    b_fold = beta.astype(jnp.float32) - mean.astype(jnp.float32) * g
    w_sf = jnp.maximum(jnp.max(jnp.abs(w_fold)), _EPS) / _QMAX
    w_q = jnp.clip(jnp.round(w_fold * (1.0 / w_sf)), -128.0, 127.0) * w_sf

    a_sf_in = jnp.maximum(jnp.max(jnp.abs(x)), _EPS) / _QMAX
    x_q = jnp.clip(jnp.round(x * (1.0 / a_sf_in)), -128.0, 127.0) * a_sf_in

    y = jnp.einsum("oc,nchw->nohw", w_q, x_q,
                   precision=jax.lax.Precision.HIGHEST)
    y = jnp.maximum(y + b_fold[None, :, None, None], 0.0)
    a_sf_out = jnp.maximum(jnp.max(jnp.abs(y)), _EPS) / _QMAX
    y_q = jnp.clip(jnp.round(y * (1.0 / a_sf_out)), -128.0, 127.0) * a_sf_out
    return y_q, a_sf_out, dict(a_sf_in=a_sf_in, w_sf=w_sf, y_raw=y)


if __name__ == "__main__":
    key = jax.random.PRNGKey(0)
    kx, kw, kg, kb, km, kv = jax.random.split(key, 6)
    N, Cin, Cout, H, W = 2, 8, 16, 16, 16

    x = jax.random.normal(kx, (N, Cin, H, W), jnp.float32) * 2.0
    weight = jax.random.normal(kw, (Cout, Cin, 1, 1), jnp.float32) * 0.2
    gamma = 1.0 + 0.1 * jax.random.normal(kg, (Cout,), jnp.float32)
    beta = 0.1 * jax.random.normal(kb, (Cout,), jnp.float32)
    running_mean = 0.1 * jax.random.normal(km, (Cout,), jnp.float32)
    running_var = 1.0 + 0.1 * jax.random.uniform(kv, (Cout,), jnp.float32)

    out, a_sf, aux = q_conv1x1_branch(x, weight, gamma, beta,
                                      running_mean, running_var,
                                      return_aux=True)
    out = jax.block_until_ready(out)
    a_sf = jax.block_until_ready(a_sf)

    ref_out, ref_sf, ref_aux = _reference(x, weight, gamma, beta,
                                          running_mean, running_var)

    assert out.shape == (N, Cout, H, W), out.shape
    # Input activation scale: exact (max-of-tile-maxes == global max).
    assert jnp.allclose(aux["a_sf_in"], ref_aux["a_sf_in"], rtol=1e-6)
    assert jnp.allclose(aux["w_sf"], ref_aux["w_sf"], rtol=1e-6)
    # Raw conv+ReLU output (tolerance covers matmul summation-order differences).
    assert jnp.allclose(aux["y_raw"], ref_aux["y_raw"], atol=1e-4, rtol=1e-4)
    # Output activation scale.
    assert jnp.allclose(a_sf, ref_sf, rtol=1e-4)
    # The re-quantization kernel must exactly reproduce the quant formula on its
    # own inputs (same scalars, same elementwise ops).
    requant_ref = jnp.clip(jnp.round(aux["y_raw"] * (1.0 / a_sf)),
                           -128.0, 127.0) * a_sf
    assert jnp.allclose(out, requant_ref, atol=1e-5)
    # End-to-end vs the pure-JAX reference: allow at most one quantization LSB
    # of disagreement (possible round() flip from sub-1e-6 matmul differences).
    assert float(jnp.max(jnp.abs(out - ref_out))) <= float(ref_sf) * 1.001 + 1e-5

    print("KERNEL_OK")
</pallas_src>

<mosaic_0001>
module attributes {stable_mosaic.version = 11 : i64} {
  func.func @_absmax_kernel(%arg0: i32, %arg1: i32, %arg2: memref<16x256xf32, #tpu.memory_space<vmem>>, %arg3: memref<1x1xf32, #tpu.memory_space<smem>>) attributes {dimension_semantics = [#tpu.dimension_semantics<parallel>, #tpu.dimension_semantics<parallel>], iteration_bounds = array<i64: 1, 1>, scalar_prefetch = 0 : i64, scratch_operands = 0 : i64, tpu.core_type = #tpu.core_type<tc>, window_params = [{transform_indices = @transform_0, window_bounds = array<i64: 16, 256>}, {transform_indices = @transform_1, window_bounds = array<i64: 1, 1>}]} {
    %c0 = arith.constant 0 : index
    %c0_0 = arith.constant 0 : index
    %0 = vector.load %arg2[%c0, %c0_0] : memref<16x256xf32, #tpu.memory_space<vmem>>, vector<16x256xf32>
    %1 = math.absf %0 : vector<16x256xf32>
    %2 = vector.shape_cast %1 : vector<16x256xf32> to vector<1x16x256xf32>
    %cst = arith.constant dense<0xFF800000> : vector<1xf32>
    %3 = vector.multi_reduction <maximumf>, %2, %cst [1, 2] : vector<1x16x256xf32> to vector<1xf32>
    %4 = vector.shape_cast %3 : vector<1xf32> to vector<1x1x1xf32>
    %5 = vector.extract %4[0, 0, 0] : f32 from vector<1x1x1xf32>
    %c0_1 = arith.constant 0 : index
    %c0_2 = arith.constant 0 : index
    %6 = memref.load %arg3[%c0_1, %c0_2] : memref<1x1xf32, #tpu.memory_space<smem>>
    memref.store %5, %arg3[%c0_1, %c0_2] : memref<1x1xf32, #tpu.memory_space<smem>>
    return
  }
  func.func @transform_0(%arg0: i32, %arg1: i32) -> (i32, i32) {
    %c0_i32 = arith.constant 0 : i32
    return %arg0, %arg1 : i32, i32
  }
  func.func @transform_1(%arg0: i32, %arg1: i32) -> (i32, i32) {
    %c0_i32 = arith.constant 0 : i32
    return %arg0, %arg1 : i32, i32
  }
}

</mosaic_0001>

<bundles_post_ra>
// kernel: tpu_custom_call.1
= control target key start
LH: loop header
LB: loop body
LE: loop exit
PB: predicated region body
PF: predicated region fallthrough
CT: control target
= control target key end

     0   :  { %6 = vsyncpa [#allocation3], 0  ;;  %s142_s0 = inlined_call_operand.hbm [shape: f32[16,256], index: 0, kind: input, shape index: {}]   ;;  %s143_s1 = inlined_call_operand.hbm [shape: f32[1,1], index: 1, kind: output, shape index: {}]  }
   0x1   :  { %7 = vsyncpa [#allocation4], 0  ;;  %s104_s6 = smov [#allocation2]   ;;  %s65_s10 = scalar_lea.hbm %s142_s0, 512 }
   0x2   :  { %s13_s7 = sshll.u32 %s104_s6, 4  ;;  %p66_p0 = scmp.ne.s32.totalorder %s142_s0, %s65_s10  ;;  %s14_s7 = int_to_ptr.vmem [resolvable:$true] %s13_s7 }
   0x3   :  { %p69_p1 = scmp.lt.u32.totalorder %s65_s10, %s142_s0 }
   0x5   :  { %p71_p2 = pnand %p69_p1, %p66_p0 }
   0x7   :  { %74 = shalt.err (!%p71_p2)
}
   0x8   :  { %s75_s15 = scalar_lea.vmem %s14_s7, 512  ;;  %p80_p4 = scmp.lt.s32.totalorder %s14_s7, %s14_s7 }
   0x9   :  { %p76_p3 = scmp.ne.s32.totalorder %s14_s7, %s75_s15  ;;  %p81_p5 = scmp.lt.s32.totalorder %s75_s15, %s75_s15 }
   0xb   :  { %p82_p6 = por %p81_p5, %p80_p4 }
   0xd   :  { %p83_p7 = pnand %p82_p6, %p76_p3 }
   0xf   :  { %86 = shalt.err (!%p83_p7)
}
  0x10   :  { %s105_s16 = smov 256   ;;  %s106_s17 = smov 16  }
  0x11   :  { %19 = dma.hbm_to_vmem [thread:$0]  %s142_s0, 512, %s14_s7, [#allocation3], %s105_s16, %s105_s16, %s106_s17  }
  0x12   :  { %97 = dma.done.wait [#allocation3], 512  }
  0x13   :  { %98 = vsyncadd [#allocation3], 4294966784  ;;  %v23_v0 = vld [vmem:[#allocation2] sm:$0xff]  ;;  %v24_v1 = vld [vmem:[#allocation2 + $0x8] sm:$0xff]  ;;  %s87_s22 = scalar_lea.hbm %s143_s1, 16 }
  0x14   :  { %v25_v2 = vld [vmem:[#allocation2 + $0x10] sm:$0xff]  ;;  %v26_v3 = vld [vmem:[#allocation2 + $0x18] sm:$0xff]  ;;  %101 = vmaxabs.init.f32.vacc0 %v23_v0, %v24_v1  ;;  %p88_p8 = scmp.ne.s32.totalorder %s143_s1, %s87_s22  ;;  %p91_p9 = scmp.lt.u32.totalorder %s87_s22, %s143_s1 }
  0x16   :  { %102 = vmaxabs.f32.vacc0 %v25_v2, %v26_v3  ;;  %p93_p10 = pnand %p91_p9, %p88_p8 }
  0x18   :  { %v103_v4 = vmovacc.low.even.vacc0 }
  0x1a   :  { %34 = vmax.xlane.f32.xlu0 %v103_v4 }
  0xa7   :  { %v35_v5 = vpop.xlane.xlu0 %34 }
  0xa8   :  { %v36_v6 = vrot.slane %v35_v5, 4 }
  0xaa   :  { %v37_v7 = vmax.f32 %v35_v5, %v36_v6 }
  0xac   :  { %v38_v8 = vrot.slane %v37_v7, 2 }
  0xae   :  { %v39_v9 = vmax.f32 %v37_v7, %v38_v8 }
  0xb0   :  { %v40_v10 = vrot.slane %v39_v9, 1 }
  0xb2   :  { %v41_v11 = vmax.f32 %v39_v9, %v40_v10 }
  0xb4   :  { %59 = vpush %v41_v11 }
  0xe5   :  { %s60_s20 = spop %59 }
  0xe6   :  { %44 = sst [smem:[#allocation5]] %s60_s20 }
  0xe7   :  { %96 = shalt.err (!%p93_p10)
}
  0xe8   :  { %s107_s27 = smov [#allocation5]  }
  0xe9   :  { %52 = dma.smem_to_hbm %s107_s27, 16, %s143_s1, [#allocation4]  }
  0xea   :  { %99 = dma.done.wait [#allocation4], 16  }
  0xeb   :  { %100 = vsyncadd [#allocation4], 4294967280 }
  0xec   :  { %56 = sfence }
  0xed   :  { %57 = vsyncpa [#allocation3], 1 }
  0xee   :  { %58 = vsyncpa [#allocation4], 1 }

</bundles_post_ra>
